<compile_context>
chip_gen: v6e
topology: v6e:2x2x1
jax: 0.10.0
libtpu: 0.0.40
codegen_flags: <defaults>
</compile_context>

<pallas_src>
import functools

import jax
import jax.numpy as jnp
from jax.experimental import pallas as pl
from jax.experimental.pallas import tpu as pltpu


def _round_up(x: int, m: int) -> int:
    return (x + m - 1) // m * m


# ----------------------------------------------------------------------------
# Fused kernel: runs every layer of the MLP on one [BM, Pin] batch tile.
#   x_ref : [BM, Pin]               padded input tile (f32)
#   refs  : w0, b0, ..., w_{L-1}, b_{L-1}, o_ref
#           w_l : [Kp_l, Np_l] bf16 (zero-padded), b_l : [1, Np_l] f32
#   o_ref : [BM, Pout]              padded output tile (lane-dense store)
# The running activation is an SSA value (register-resident); no VMEM scratch.
# ----------------------------------------------------------------------------
def _fused_mlp_kernel(x_ref, *refs, n_layers: int):
    o_ref = refs[2 * n_layers]
    h = x_ref[...].astype(jnp.float32)                    # [BM, Pin]
    for l in range(n_layers):                             # static Python unroll
        w = refs[2 * l][...]                              # [Kp_l, Np_l] bf16
        b = refs[2 * l + 1][...]                          # [1, Np_l]   f32
        y = jnp.dot(h.astype(jnp.bfloat16), w,            # bf16 MXU, f32 acc
                    preferred_element_type=jnp.float32) + b
        if l < n_layers - 1:                              # ReLU on all but last
            y = jnp.maximum(y, 0.0)
        h = y
    o_ref[...] = h.astype(o_ref.dtype)                    # lane-dense vst


# ----------------------------------------------------------------------------
# Parameter construction (mimics torchrl Net.__init__):
#   base   = MLP(input_shape, hidden_shapes)  -> Linear + act per hidden
#   append = Linear + act per append_hidden_shape
#   last   = Linear (small uniform init, no activation)
# ----------------------------------------------------------------------------
def init_net_params(key, input_shape, hidden_shapes, append_hidden_shapes,
                    output_shape, dtype=jnp.float32):
    params = {"base": [], "append": []}
    in_dim = input_shape

    def dense_init(k, fan_in, fan_out, scale):
        kw, kb = jax.random.split(k)
        w = jax.random.uniform(kw, (fan_in, fan_out), dtype,
                               minval=-scale, maxval=scale)
        b = jax.random.uniform(kb, (fan_out,), dtype,
                               minval=-scale, maxval=scale)
        return w, b

    for h in hidden_shapes:
        key, sub = jax.random.split(key)
        params["base"].append(dense_init(sub, in_dim, h, 1.0 / jnp.sqrt(in_dim)))
        in_dim = h

    for h in append_hidden_shapes:
        key, sub = jax.random.split(key)
        params["append"].append(dense_init(sub, in_dim, h, 1.0 / jnp.sqrt(in_dim)))
        in_dim = h

    key, sub = jax.random.split(key)
    params["last"] = dense_init(sub, in_dim, output_shape, 3e-3)
    return params


def pack_params(params, input_dim, lane=128, weight_dtype=jnp.bfloat16):
    """Pad each layer to its OWN 128-multiple tile; weights bf16, biases f32."""
    layers = list(params["base"]) + list(params["append"]) + [params["last"]]
    ws, bs, shapes = [], [], []
    for (w, b) in layers:
        din, dout = w.shape
        kp, np_ = _round_up(din, lane), _round_up(dout, lane)
        ws.append(jnp.zeros((kp, np_), weight_dtype)
                  .at[:din, :dout].set(w.astype(weight_dtype)))
        bs.append(jnp.zeros((1, np_), jnp.float32)
                  .at[0, :dout].set(b.astype(jnp.float32)))
        shapes.append((kp, np_))
    out_dim = layers[-1][0].shape[1]
    return {"w": ws, "b": bs, "shapes": shapes, "n_layers": len(layers),
            "in_dim": input_dim, "out_dim": out_dim,
            "pin": _round_up(input_dim, lane), "pout": _round_up(out_dim, lane)}


def _const_spec(shape, pipeline_mode):
    """Resident block: same tile for every grid step (constant index_map)."""
    if pipeline_mode is None:
        return pl.BlockSpec(shape, lambda i: (0, 0))
    return pl.BlockSpec(shape, lambda i: (0, 0), pipeline_mode=pipeline_mode)


def net_forward(packed, x):
    """x: [B, in_dim] -> [B, out_dim], one fused pallas_call."""
    B, Din = x.shape
    assert Din == packed["in_dim"]
    L, Pin, Pout, Dout = (packed["n_layers"], packed["pin"],
                          packed["pout"], packed["out_dim"])

    # --- batch tiling --------------------------------------------------------
    if B < 16:
        BM, ntiles = _round_up(B, 8), 1            # single sublane-padded tile
    elif B <= 128:
        BM, ntiles = _round_up(pl.cdiv(B, 2), 8), 2  # 2 tiles -> both TCs (v7x)
    else:
        BM = 256                                   # feed 256-wide MXU M dim
        ntiles = pl.cdiv(B, BM)
    Bp = BM * ntiles

    xp = jnp.zeros((Bp, Pin), x.dtype).at[:B, :Din].set(x)

    flat_params = []
    for wl, bl in zip(packed["w"], packed["b"]):
        flat_params += [wl, bl]

    flops = sum(2 * Bp * kp * np_ for (kp, np_) in packed["shapes"])
    bytes_accessed = (xp.size * xp.dtype.itemsize
                      + sum(int(a.size) * a.dtype.itemsize for a in flat_params)
                      + Bp * Pout * xp.dtype.itemsize)
    cost = pl.CostEstimate(flops=flops, transcendentals=0,
                           bytes_accessed=bytes_accessed)

    kernel = functools.partial(_fused_mlp_kernel, n_layers=L)

    def _call(single_buffer_weights):
        pm = pl.Buffered(1) if single_buffer_weights else None
        wb_specs = []
        for (kp, np_) in packed["shapes"]:
            wb_specs.append(_const_spec((kp, np_), pm))   # weight, resident
            wb_specs.append(_const_spec((1, np_), pm))    # bias, resident
        return pl.pallas_call(
            kernel,
            out_shape=jax.ShapeDtypeStruct((Bp, Pout), x.dtype),
            grid_spec=pltpu.PrefetchScalarGridSpec(
                num_scalar_prefetch=0,
                grid=(ntiles,),
                in_specs=[pl.BlockSpec((BM, Pin), lambda i: (i, 0))] + wb_specs,
                out_specs=pl.BlockSpec((BM, Pout), lambda i: (i, 0)),
            ),
            compiler_params=pltpu.CompilerParams(
                dimension_semantics=("parallel",)),       # batch tiles across TCs
            cost_estimate=cost,
        )(xp, *flat_params)

    try:
        out = _call(True)     # constant-index weights: single-buffered
    except Exception:
        out = _call(False)    # fallback: default double-buffering
    return out[:B, :Dout]


if __name__ == "__main__":
    key = jax.random.PRNGKey(0)
    kx, kp = jax.random.split(key)

    batch = 8
    input_shape = 32
    hidden_shapes = [32, 32]        # base MLP hidden layers
    append_hidden_shapes = [32]     # append_fcs
    output_shape = 16

    x = jax.random.normal(kx, (batch, input_shape), dtype=jnp.float32)
    params = init_net_params(kp, input_shape, hidden_shapes,
                             append_hidden_shapes, output_shape)
    packed = pack_params(params, input_shape)

    out = net_forward(packed, x)
    out = jax.block_until_ready(out)

    # Reference: plain jnp with the same bf16-operand / f32-accumulate recipe.
    def dense(h, w, b):
        return jnp.dot(h.astype(jnp.bfloat16), w.astype(jnp.bfloat16),
                       preferred_element_type=jnp.float32) + b.astype(jnp.float32)

    ref = x
    for w, b in params["base"] + params["append"]:
        ref = jnp.maximum(dense(ref, w, b), 0.0)
    w, b = params["last"]
    ref = dense(ref, w, b)

    assert out.shape == (batch, output_shape)
    assert jnp.allclose(out, ref, atol=1e-4, rtol=1e-4), \
        float(jnp.max(jnp.abs(out - ref)))

    print("KERNEL_OK")
</pallas_src>

<mosaic_0001>
module attributes {stable_mosaic.version = 11 : i64} {
  func.func @_fused_mlp_kernel(%arg0: i32, %arg1: memref<8x128xf32, #tpu.memory_space<vmem>>, %arg2: memref<128x128xbf16, #tpu.memory_space<vmem>>, %arg3: memref<1x128xf32, #tpu.memory_space<vmem>>, %arg4: memref<128x128xbf16, #tpu.memory_space<vmem>>, %arg5: memref<1x128xf32, #tpu.memory_space<vmem>>, %arg6: memref<128x128xbf16, #tpu.memory_space<vmem>>, %arg7: memref<1x128xf32, #tpu.memory_space<vmem>>, %arg8: memref<128x128xbf16, #tpu.memory_space<vmem>>, %arg9: memref<1x128xf32, #tpu.memory_space<vmem>>, %arg10: memref<8x128xf32, #tpu.memory_space<vmem>>) attributes {dimension_semantics = [#tpu.dimension_semantics<parallel>], iteration_bounds = array<i64: 1>, scalar_prefetch = 0 : i64, scratch_operands = 0 : i64, tpu.core_type = #tpu.core_type<tc>, window_params = [{transform_indices = @transform_0, window_bounds = array<i64: 8, 128>}, {pipeline_mode = #tpu.pipeline_mode<synchronous>, transform_indices = @transform_1, window_bounds = array<i64: 128, 128>}, {pipeline_mode = #tpu.pipeline_mode<synchronous>, transform_indices = @transform_2, window_bounds = array<i64: 1, 128>}, {pipeline_mode = #tpu.pipeline_mode<synchronous>, transform_indices = @transform_3, window_bounds = array<i64: 128, 128>}, {pipeline_mode = #tpu.pipeline_mode<synchronous>, transform_indices = @transform_4, window_bounds = array<i64: 1, 128>}, {pipeline_mode = #tpu.pipeline_mode<synchronous>, transform_indices = @transform_5, window_bounds = array<i64: 128, 128>}, {pipeline_mode = #tpu.pipeline_mode<synchronous>, transform_indices = @transform_6, window_bounds = array<i64: 1, 128>}, {pipeline_mode = #tpu.pipeline_mode<synchronous>, transform_indices = @transform_7, window_bounds = array<i64: 128, 128>}, {pipeline_mode = #tpu.pipeline_mode<synchronous>, transform_indices = @transform_8, window_bounds = array<i64: 1, 128>}, {transform_indices = @transform_9, window_bounds = array<i64: 8, 128>}]} {
    %c0 = arith.constant 0 : index
    %c0_0 = arith.constant 0 : index
    %0 = vector.load %arg1[%c0, %c0_0] : memref<8x128xf32, #tpu.memory_space<vmem>>, vector<8x128xf32>
    %c0_1 = arith.constant 0 : index
    %c0_2 = arith.constant 0 : index
    %1 = vector.load %arg2[%c0_1, %c0_2] : memref<128x128xbf16, #tpu.memory_space<vmem>>, vector<128x128xbf16>
    %c0_3 = arith.constant 0 : index
    %c0_4 = arith.constant 0 : index
    %2 = vector.load %arg3[%c0_3, %c0_4] : memref<1x128xf32, #tpu.memory_space<vmem>>, vector<1x128xf32>
    %3 = arith.truncf %0 : vector<8x128xf32> to vector<8x128xbf16>
    %cst = arith.constant dense<0.000000e+00> : vector<8x128xf32>
    %4 = tpu.matmul %3, %1, %cst {dimension_numbers = #tpu.dot_dimension_numbers<[1], [0], [0], [1], [0, 0, 1, 1], [], []>} : vector<8x128xbf16>, vector<128x128xbf16>, vector<8x128xf32> -> vector<8x128xf32>
    %5 = vector.broadcast %2 : vector<1x128xf32> to vector<8x128xf32>
    %6 = arith.addf %4, %5 : vector<8x128xf32>
    %cst_5 = arith.constant 0.000000e+00 : f32
    %7 = vector.broadcast %cst_5 : f32 to vector<8x128xf32>
    %8 = arith.maximumf %6, %7 : vector<8x128xf32>
    %c0_6 = arith.constant 0 : index
    %c0_7 = arith.constant 0 : index
    %9 = vector.load %arg4[%c0_6, %c0_7] : memref<128x128xbf16, #tpu.memory_space<vmem>>, vector<128x128xbf16>
    %c0_8 = arith.constant 0 : index
    %c0_9 = arith.constant 0 : index
    %10 = vector.load %arg5[%c0_8, %c0_9] : memref<1x128xf32, #tpu.memory_space<vmem>>, vector<1x128xf32>
    %11 = arith.truncf %8 : vector<8x128xf32> to vector<8x128xbf16>
    %cst_10 = arith.constant dense<0.000000e+00> : vector<8x128xf32>
    %12 = tpu.matmul %11, %9, %cst_10 {dimension_numbers = #tpu.dot_dimension_numbers<[1], [0], [0], [1], [0, 0, 1, 1], [], []>} : vector<8x128xbf16>, vector<128x128xbf16>, vector<8x128xf32> -> vector<8x128xf32>
    %13 = vector.broadcast %10 : vector<1x128xf32> to vector<8x128xf32>
    %14 = arith.addf %12, %13 : vector<8x128xf32>
    %cst_11 = arith.constant 0.000000e+00 : f32
    %15 = vector.broadcast %cst_11 : f32 to vector<8x128xf32>
    %16 = arith.maximumf %14, %15 : vector<8x128xf32>
    %c0_12 = arith.constant 0 : index
    %c0_13 = arith.constant 0 : index
    %17 = vector.load %arg6[%c0_12, %c0_13] : memref<128x128xbf16, #tpu.memory_space<vmem>>, vector<128x128xbf16>
    %c0_14 = arith.constant 0 : index
    %c0_15 = arith.constant 0 : index
    %18 = vector.load %arg7[%c0_14, %c0_15] : memref<1x128xf32, #tpu.memory_space<vmem>>, vector<1x128xf32>
    %19 = arith.truncf %16 : vector<8x128xf32> to vector<8x128xbf16>
    %cst_16 = arith.constant dense<0.000000e+00> : vector<8x128xf32>
    %20 = tpu.matmul %19, %17, %cst_16 {dimension_numbers = #tpu.dot_dimension_numbers<[1], [0], [0], [1], [0, 0, 1, 1], [], []>} : vector<8x128xbf16>, vector<128x128xbf16>, vector<8x128xf32> -> vector<8x128xf32>
    %21 = vector.broadcast %18 : vector<1x128xf32> to vector<8x128xf32>
    %22 = arith.addf %20, %21 : vector<8x128xf32>
    %cst_17 = arith.constant 0.000000e+00 : f32
    %23 = vector.broadcast %cst_17 : f32 to vector<8x128xf32>
    %24 = arith.maximumf %22, %23 : vector<8x128xf32>
    %c0_18 = arith.constant 0 : index
    %c0_19 = arith.constant 0 : index
    %25 = vector.load %arg8[%c0_18, %c0_19] : memref<128x128xbf16, #tpu.memory_space<vmem>>, vector<128x128xbf16>
    %c0_20 = arith.constant 0 : index
    %c0_21 = arith.constant 0 : index
    %26 = vector.load %arg9[%c0_20, %c0_21] : memref<1x128xf32, #tpu.memory_space<vmem>>, vector<1x128xf32>
    %27 = arith.truncf %24 : vector<8x128xf32> to vector<8x128xbf16>
    %cst_22 = arith.constant dense<0.000000e+00> : vector<8x128xf32>
    %28 = tpu.matmul %27, %25, %cst_22 {dimension_numbers = #tpu.dot_dimension_numbers<[1], [0], [0], [1], [0, 0, 1, 1], [], []>} : vector<8x128xbf16>, vector<128x128xbf16>, vector<8x128xf32> -> vector<8x128xf32>
    %29 = vector.broadcast %26 : vector<1x128xf32> to vector<8x128xf32>
    %30 = arith.addf %28, %29 : vector<8x128xf32>
    %c0_23 = arith.constant 0 : index
    %c0_24 = arith.constant 0 : index
    %31 = vector.load %arg10[%c0_23, %c0_24] : memref<8x128xf32, #tpu.memory_space<vmem>>, vector<8x128xf32>
    tpu.vector_store %arg10[%c0_23, %c0_24], %30 {strides = array<i32>} : memref<8x128xf32, #tpu.memory_space<vmem>>, vector<8x128xf32>,
    return
  }
  func.func @transform_0(%arg0: i32) -> (i32, i32) {
    %c0_i32 = arith.constant 0 : i32
    %c0_i32_0 = arith.constant 0 : i32
    return %arg0, %c0_i32 : i32, i32
  }
  func.func @transform_1(%arg0: i32) -> (i32, i32) {
    %c0_i32 = arith.constant 0 : i32
    %c0_i32_0 = arith.constant 0 : i32
    %c0_i32_1 = arith.constant 0 : i32
    return %c0_i32, %c0_i32_0 : i32, i32
  }
  func.func @transform_2(%arg0: i32) -> (i32, i32) {
    %c0_i32 = arith.constant 0 : i32
    %c0_i32_0 = arith.constant 0 : i32
    %c0_i32_1 = arith.constant 0 : i32
    return %c0_i32, %c0_i32_0 : i32, i32
  }
  func.func @transform_3(%arg0: i32) -> (i32, i32) {
    %c0_i32 = arith.constant 0 : i32
    %c0_i32_0 = arith.constant 0 : i32
    %c0_i32_1 = arith.constant 0 : i32
    return %c0_i32, %c0_i32_0 : i32, i32
  }
  func.func @transform_4(%arg0: i32) -> (i32, i32) {
    %c0_i32 = arith.constant 0 : i32
    %c0_i32_0 = arith.constant 0 : i32
    %c0_i32_1 = arith.constant 0 : i32
    return %c0_i32, %c0_i32_0 : i32, i32
  }
  func.func @transform_5(%arg0: i32) -> (i32, i32) {
    %c0_i32 = arith.constant 0 : i32
    %c0_i32_0 = arith.constant 0 : i32
    %c0_i32_1 = arith.constant 0 : i32
    return %c0_i32, %c0_i32_0 : i32, i32
  }
  func.func @transform_6(%arg0: i32) -> (i32, i32) {
    %c0_i32 = arith.constant 0 : i32
    %c0_i32_0 = arith.constant 0 : i32
    %c0_i32_1 = arith.constant 0 : i32
    return %c0_i32, %c0_i32_0 : i32, i32
  }
  func.func @transform_7(%arg0: i32) -> (i32, i32) {
    %c0_i32 = arith.constant 0 : i32
    %c0_i32_0 = arith.constant 0 : i32
    %c0_i32_1 = arith.constant 0 : i32
    return %c0_i32, %c0_i32_0 : i32, i32
  }
  func.func @transform_8(%arg0: i32) -> (i32, i32) {
    %c0_i32 = arith.constant 0 : i32
    %c0_i32_0 = arith.constant 0 : i32
    %c0_i32_1 = arith.constant 0 : i32
    return %c0_i32, %c0_i32_0 : i32, i32
  }
  func.func @transform_9(%arg0: i32) -> (i32, i32) {
    %c0_i32 = arith.constant 0 : i32
    %c0_i32_0 = arith.constant 0 : i32
    return %arg0, %c0_i32 : i32, i32
  }
}

module attributes {stable_mosaic.version = 11 : i64} {
  func.func @_fused_mlp_kernel(%arg0: i32, %arg1: memref<8x128xf32, #tpu.memory_space<vmem>>, %arg2: memref<128x128xbf16, #tpu.memory_space<vmem>>, %arg3: memref<1x128xf32, #tpu.memory_space<vmem>>, %arg4: memref<128x128xbf16, #tpu.memory_space<vmem>>, %arg5: memref<1x128xf32, #tpu.memory_space<vmem>>, %arg6: memref<128x128xbf16, #tpu.memory_space<vmem>>, %arg7: memref<1x128xf32, #tpu.memory_space<vmem>>, %arg8: memref<128x128xbf16, #tpu.memory_space<vmem>>, %arg9: memref<1x128xf32, #tpu.memory_space<vmem>>, %arg10: memref<8x128xf32, #tpu.memory_space<vmem>>) attributes {dimension_semantics = [#tpu.dimension_semantics<parallel>], iteration_bounds = array<i64: 1>, scalar_prefetch = 0 : i64, scratch_operands = 0 : i64, tpu.core_type = #tpu.core_type<tc>, window_params = [{transform_indices = @transform_0, window_bounds = array<i64: 8, 128>}, {pipeline_mode = #tpu.pipeline_mode<synchronous>, transform_indices = @transform_1, window_bounds = array<i64: 128, 128>}, {pipeline_mode = #tpu.pipeline_mode<synchronous>, transform_indices = @transform_2, window_bounds = array<i64: 1, 128>}, {pipeline_mode = #tpu.pipeline_mode<synchronous>, transform_indices = @transform_3, window_bounds = array<i64: 128, 128>}, {pipeline_mode = #tpu.pipeline_mode<synchronous>, transform_indices = @transform_4, window_bounds = array<i64: 1, 128>}, {pipeline_mode = #tpu.pipeline_mode<synchronous>, transform_indices = @transform_5, window_bounds = array<i64: 128, 128>}, {pipeline_mode = #tpu.pipeline_mode<synchronous>, transform_indices = @transform_6, window_bounds = array<i64: 1, 128>}, {pipeline_mode = #tpu.pipeline_mode<synchronous>, transform_indices = @transform_7, window_bounds = array<i64: 128, 128>}, {pipeline_mode = #tpu.pipeline_mode<synchronous>, transform_indices = @transform_8, window_bounds = array<i64: 1, 128>}, {transform_indices = @transform_9, window_bounds = array<i64: 8, 128>}]} {
    %c0 = arith.constant 0 : index
    %c0_0 = arith.constant 0 : index
    %0 = vector.load %arg1[%c0, %c0_0] : memref<8x128xf32, #tpu.memory_space<vmem>>, vector<8x128xf32>
    %c0_1 = arith.constant 0 : index
    %c0_2 = arith.constant 0 : index
    %1 = vector.load %arg2[%c0_1, %c0_2] : memref<128x128xbf16, #tpu.memory_space<vmem>>, vector<128x128xbf16>
    %c0_3 = arith.constant 0 : index
    %c0_4 = arith.constant 0 : index
    %2 = vector.load %arg3[%c0_3, %c0_4] : memref<1x128xf32, #tpu.memory_space<vmem>>, vector<1x128xf32>
    %3 = arith.truncf %0 : vector<8x128xf32> to vector<8x128xbf16>
    %cst = arith.constant dense<0.000000e+00> : vector<8x128xf32>
    %4 = tpu.matmul %3, %1, %cst {dimension_numbers = #tpu.dot_dimension_numbers<[1], [0], [0], [1], [0, 0, 1, 1], [], []>} : vector<8x128xbf16>, vector<128x128xbf16>, vector<8x128xf32> -> vector<8x128xf32>
    %5 = vector.broadcast %2 : vector<1x128xf32> to vector<8x128xf32>
    %6 = arith.addf %4, %5 : vector<8x128xf32>
    %cst_5 = arith.constant 0.000000e+00 : f32
    %7 = vector.broadcast %cst_5 : f32 to vector<8x128xf32>
    %8 = arith.maximumf %6, %7 : vector<8x128xf32>
    %c0_6 = arith.constant 0 : index
    %c0_7 = arith.constant 0 : index
    %9 = vector.load %arg4[%c0_6, %c0_7] : memref<128x128xbf16, #tpu.memory_space<vmem>>, vector<128x128xbf16>
    %c0_8 = arith.constant 0 : index
    %c0_9 = arith.constant 0 : index
    %10 = vector.load %arg5[%c0_8, %c0_9] : memref<1x128xf32, #tpu.memory_space<vmem>>, vector<1x128xf32>
    %11 = arith.truncf %8 : vector<8x128xf32> to vector<8x128xbf16>
    %cst_10 = arith.constant dense<0.000000e+00> : vector<8x128xf32>
    %12 = tpu.matmul %11, %9, %cst_10 {dimension_numbers = #tpu.dot_dimension_numbers<[1], [0], [0], [1], [0, 0, 1, 1], [], []>} : vector<8x128xbf16>, vector<128x128xbf16>, vector<8x128xf32> -> vector<8x128xf32>
    %13 = vector.broadcast %10 : vector<1x128xf32> to vector<8x128xf32>
    %14 = arith.addf %12, %13 : vector<8x128xf32>
    %cst_11 = arith.constant 0.000000e+00 : f32
    %15 = vector.broadcast %cst_11 : f32 to vector<8x128xf32>
    %16 = arith.maximumf %14, %15 : vector<8x128xf32>
    %c0_12 = arith.constant 0 : index
    %c0_13 = arith.constant 0 : index
    %17 = vector.load %arg6[%c0_12, %c0_13] : memref<128x128xbf16, #tpu.memory_space<vmem>>, vector<128x128xbf16>
    %c0_14 = arith.constant 0 : index
    %c0_15 = arith.constant 0 : index
    %18 = vector.load %arg7[%c0_14, %c0_15] : memref<1x128xf32, #tpu.memory_space<vmem>>, vector<1x128xf32>
    %19 = arith.truncf %16 : vector<8x128xf32> to vector<8x128xbf16>
    %cst_16 = arith.constant dense<0.000000e+00> : vector<8x128xf32>
    %20 = tpu.matmul %19, %17, %cst_16 {dimension_numbers = #tpu.dot_dimension_numbers<[1], [0], [0], [1], [0, 0, 1, 1], [], []>} : vector<8x128xbf16>, vector<128x128xbf16>, vector<8x128xf32> -> vector<8x128xf32>
    %21 = vector.broadcast %18 : vector<1x128xf32> to vector<8x128xf32>
    %22 = arith.addf %20, %21 : vector<8x128xf32>
    %cst_17 = arith.constant 0.000000e+00 : f32
    %23 = vector.broadcast %cst_17 : f32 to vector<8x128xf32>
    %24 = arith.maximumf %22, %23 : vector<8x128xf32>
    %c0_18 = arith.constant 0 : index
    %c0_19 = arith.constant 0 : index
    %25 = vector.load %arg8[%c0_18, %c0_19] : memref<128x128xbf16, #tpu.memory_space<vmem>>, vector<128x128xbf16>
    %c0_20 = arith.constant 0 : index
    %c0_21 = arith.constant 0 : index
    %26 = vector.load %arg9[%c0_20, %c0_21] : memref<1x128xf32, #tpu.memory_space<vmem>>, vector<1x128xf32>
    %27 = arith.truncf %24 : vector<8x128xf32> to vector<8x128xbf16>
    %cst_22 = arith.constant dense<0.000000e+00> : vector<8x128xf32>
    %28 = tpu.matmul %27, %25, %cst_22 {dimension_numbers = #tpu.dot_dimension_numbers<[1], [0], [0], [1], [0, 0, 1, 1], [], []>} : vector<8x128xbf16>, vector<128x128xbf16>, vector<8x128xf32> -> vector<8x128xf32>
    %29 = vector.broadcast %26 : vector<1x128xf32> to vector<8x128xf32>
    %30 = arith.addf %28, %29 : vector<8x128xf32>
    %c0_23 = arith.constant 0 : index
    %c0_24 = arith.constant 0 : index
    %31 = vector.load %arg10[%c0_23, %c0_24] : memref<8x128xf32, #tpu.memory_space<vmem>>, vector<8x128xf32>
    tpu.vector_store %arg10[%c0_23, %c0_24], %30 {strides = array<i32>} : memref<8x128xf32, #tpu.memory_space<vmem>>, vector<8x128xf32>,
    return
  }
  func.func @transform_0(%arg0: i32) -> (i32, i32) {
    %c0_i32 = arith.constant 0 : i32
    %c0_i32_0 = arith.constant 0 : i32
    return %arg0, %c0_i32 : i32, i32
  }
  func.func @transform_1(%arg0: i32) -> (i32, i32) {
    %c0_i32 = arith.constant 0 : i32
    %c0_i32_0 = arith.constant 0 : i32
    %c0_i32_1 = arith.constant 0 : i32
    return %c0_i32, %c0_i32_0 : i32, i32
  }
  func.func @transform_2(%arg0: i32) -> (i32, i32) {
    %c0_i32 = arith.constant 0 : i32
    %c0_i32_0 = arith.constant 0 : i32
    %c0_i32_1 = arith.constant 0 : i32
    return %c0_i32, %c0_i32_0 : i32, i32
  }
  func.func @transform_3(%arg0: i32) -> (i32, i32) {
    %c0_i32 = arith.constant 0 : i32
    %c0_i32_0 = arith.constant 0 : i32
    %c0_i32_1 = arith.constant 0 : i32
    return %c0_i32, %c0_i32_0 : i32, i32
  }
  func.func @transform_4(%arg0: i32) -> (i32, i32) {
    %c0_i32 = arith.constant 0 : i32
    %c0_i32_0 = arith.constant 0 : i32
    %c0_i32_1 = arith.constant 0 : i32
    return %c0_i32, %c0_i32_0 : i32, i32
  }
  func.func @transform_5(%arg0: i32) -> (i32, i32) {
    %c0_i32 = arith.constant 0 : i32
    %c0_i32_0 = arith.constant 0 : i32
    %c0_i32_1 = arith.constant 0 : i32
    return %c0_i32, %c0_i32_0 : i32, i32
  }
  func.func @transform_6(%arg0: i32) -> (i32, i32) {
    %c0_i32 = arith.constant 0 : i32
    %c0_i32_0 = arith.constant 0 : i32
    %c0_i32_1 = arith.constant 0 : i32
    return %c0_i32, %c0_i32_0 : i32, i32
  }
  func.func @transform_7(%arg0: i32) -> (i32, i32) {
    %c0_i32 = arith.constant 0 : i32
    %c0_i32_0 = arith.constant 0 : i32
    %c0_i32_1 = arith.constant 0 : i32
    return %c0_i32, %c0_i32_0 : i32, i32
  }
  func.func @transform_8(%arg0: i32) -> (i32, i32) {
    %c0_i32 = arith.constant 0 : i32
    %c0_i32_0 = arith.constant 0 : i32
    %c0_i32_1 = arith.constant 0 : i32
    return %c0_i32, %c0_i32_0 : i32, i32
  }
  func.func @transform_9(%arg0: i32) -> (i32, i32) {
    %c0_i32 = arith.constant 0 : i32
    %c0_i32_0 = arith.constant 0 : i32
    return %arg0, %c0_i32 : i32, i32
  }
}

</mosaic_0001>

<bundles_post_ra>
// kernel: tpu_custom_call.1
= control target key start
LH: loop header
LB: loop body
LE: loop exit
PB: predicated region body
PF: predicated region fallthrough
CT: control target
= control target key end

     0   :  { %14 = vsyncpa [#allocation3], 0  ;;  %s1034_s0 = inlined_call_operand.hbm [shape: f32[8,128], index: 0, kind: input, shape index: {}]   ;;  %s1035_s1 = inlined_call_operand.hbm [shape: bf16[128,128], index: 1, kind: input, shape index: {}]   ;;  %s1036_s2 = inlined_call_operand.vmem [shape: f32[1,128], index: 2, kind: input, shape index: {}]   ;;  %s1037_s3 = inlined_call_operand.hbm [shape: bf16[128,128], index: 3, kind: input, shape index: {}]   ;;  %s1038_s4 = inlined_call_operand.vmem [shape: f32[1,128], index: 4, kind: input, shape index: {}]   ;;  %s1039_s5 = inlined_call_operand.hbm [shape: bf16[128,128], index: 5, kind: input, shape index: {}]   ;;  %s1040_s6 = inlined_call_operand.vmem [shape: f32[1,128], index: 6, kind: input, shape index: {}]   ;;  %s1041_s7 = inlined_call_operand.hbm [shape: bf16[128,128], index: 7, kind: input, shape index: {}]   ;;  %s1042_s8 = inlined_call_operand.vmem [shape: f32[1,128], index: 8, kind: input, shape index: {}]   ;;  %s1043_s9 = inlined_call_operand.hbm [shape: f32[8,128], index: 9, kind: output, shape index: {}]  }
   0x1   :  { %15 = vsyncpa [#allocation6], 0 }
   0x2   :  { %16 = vsyncpa [#allocation9], 0 }
   0x3   :  { %17 = vsyncpa [#allocation4], 0  ;;  %s892_s30 = smov [#allocation5]  }
   0x4   :  { %s33_s10 = sshll.u32 %s892_s30, 4  ;;  %s34_s10 = int_to_ptr.vmem [resolvable:$true] %s33_s10 }
   0x5   :  { %s772_s11 = scalar_lea.vmem %s34_s10, 1024  ;;  %p777_p1 = scmp.lt.s32.totalorder %s34_s10, %s34_s10 }
   0x6   :  { %p773_p0 = scmp.ne.s32.totalorder %s34_s10, %s772_s11  ;;  %p778_p2 = scmp.lt.s32.totalorder %s772_s11, %s772_s11 }
   0x8   :  { %p779_p3 = por %p778_p2, %p777_p1 }
   0xa   :  { %p780_p4 = pnand %p779_p3, %p773_p0 }
   0xc   :  { %783 = shalt.err (!%p780_p4)
}
   0xd   :  { %s893_s12 = smov 64   ;;  %s894_s13 = smov 4  }
   0xe   :  { %39 = dma.hbm_to_vmem [thread:$0]  %s1035_s1, 1024, %s34_s10, [#allocation6], %s893_s12, %s893_s12, %s894_s13  }
   0xf   :  { %s895_s16 = smov [#allocation8]   ;;  %s896_s18 = smov [#allocation2]  }
  0x10   :  { %s61_s17 = sshll.u32 %s895_s16, 4  ;;  %s24_s19 = sshll.u32 %s896_s18, 4  ;;  %s62_s17 = int_to_ptr.vmem [resolvable:$true] %s61_s17  ;;  %s25_s19 = int_to_ptr.vmem [resolvable:$true] %s24_s19 }
  0x11   :  { %s792_s20 = scalar_lea.vmem %s62_s17, 1024  ;;  %p797_p6 = scmp.lt.s32.totalorder %s62_s17, %s62_s17 }
  0x12   :  { %p793_p5 = scmp.ne.s32.totalorder %s62_s17, %s792_s20  ;;  %p798_p7 = scmp.lt.s32.totalorder %s792_s20, %s792_s20 }
  0x14   :  { %p799_p8 = por %p798_p7, %p797_p6 }
  0x16   :  { %p800_p9 = pnand %p799_p8, %p793_p5 }
  0x18   :  { %803 = shalt.err (!%p800_p9)
}
  0x19   :  { %67 = dma.hbm_to_vmem [thread:$0]  %s1039_s5, 1024, %s62_s17, [#allocation9], %s893_s12, %s893_s12, %s894_s13  }
  0x1a   :  { %s812_s1 = scalar_lea.vmem %s25_s19, 128  ;;  %p817_p11 = scmp.lt.s32.totalorder %s25_s19, %s25_s19 }
  0x1b   :  { %p813_p10 = scmp.ne.s32.totalorder %s25_s19, %s812_s1  ;;  %p818_p12 = scmp.lt.s32.totalorder %s812_s1, %s812_s1 }
  0x1d   :  { %p819_p13 = por %p818_p12, %p817_p11 }
  0x1f   :  { %p820_p0 = pnand %p819_p13, %p813_p10 }
  0x21   :  { %823 = shalt.err (!%p820_p0)
}
  0x22   :  { %27 = dma.hbm_to_vmem [thread:$0]  %s1034_s0, 128, %s25_s19, [#allocation3]  }
  0x23   :  { %s897_s25 = smov [#allocation7]   ;;  %s898_s27 = smov [#allocation10]  }
  0x24   :  { %s47_s26 = sshll.u32 %s897_s25, 4  ;;  %s75_s28 = sshll.u32 %s898_s27, 4  ;;  %s48_s26 = int_to_ptr.vmem [resolvable:$true] %s47_s26  ;;  %s76_s28 = int_to_ptr.vmem [resolvable:$true] %s75_s28 }
  0x25   :  { %s832_s29 = scalar_lea.vmem %s48_s26, 1024  ;;  %p837_p2 = scmp.lt.s32.totalorder %s48_s26, %s48_s26 }
  0x26   :  { %p833_p1 = scmp.ne.s32.totalorder %s48_s26, %s832_s29  ;;  %p838_p3 = scmp.lt.s32.totalorder %s832_s29, %s832_s29 }
  0x28   :  { %p839_p4 = por %p838_p3, %p837_p2 }
  0x2a   :  { %p840_p5 = pnand %p839_p4, %p833_p1 }
  0x2c   :  { %843 = shalt.err (!%p840_p5)
}
  0x2d   :  { %53 = dma.hbm_to_vmem [thread:$0]  %s1037_s3, 1024, %s48_s26, [#allocation6], %s893_s12, %s893_s12, %s894_s13  }
  0x2e   :  { %s852_s0 = scalar_lea.vmem %s76_s28, 1024  ;;  %p857_p7 = scmp.lt.s32.totalorder %s76_s28, %s76_s28 }
  0x2f   :  { %p853_p6 = scmp.ne.s32.totalorder %s76_s28, %s852_s0  ;;  %p858_p8 = scmp.lt.s32.totalorder %s852_s0, %s852_s0 }
  0x31   :  { %p859_p9 = por %p858_p8, %p857_p7 }
  0x33   :  { %p860_p10 = pnand %p859_p9, %p853_p6 }
  0x35   :  { %863 = shalt.err (!%p860_p10)
}
  0x36   :  { %81 = dma.hbm_to_vmem [thread:$0]  %s1041_s7, 1024, %s76_s28, [#allocation9], %s893_s12, %s893_s12, %s894_s13  }
  0x37   :  { %884 = dma.done.wait [#allocation3], 128  }
  0x38   :  { %885 = vsyncadd [#allocation3], 4294967168 }
  0x39   :  { %886 = dma.done.wait [#allocation6], 2048  }
  0x3a   :  { %887 = vsyncadd [#allocation6], 4294965248 }
  0x3b   :  { %888 = dma.done.wait [#allocation9], 2048  }
  0x3c   :  { %889 = vsyncadd [#allocation9], 4294965248  ;;  %v899_v0 = vmov 0.0   ;;  %vm900_vm0 = vmmov 0   ;;  %v732_v1 = vld [vmem:[#allocation5 + $0x38] sm:$0xff]   ;;  %v733_v2 = vld [vmem:[#allocation5 + $0x30] sm:$0xff]  }
  0x3d   :  { %642 = vmatprep.subr.bf16.mxu0 %v899_v0  ;;  %658 = vmatprep.mubr.msk.bf16.mxu0 %vm900_vm0, %v899_v0  ;;  %v734_v3 = vld [vmem:[#allocation5 + $0x28] sm:$0xff]   ;;  %v740_v4 = vld [vmem:[#allocation7 + $0x38] sm:$0xff]   ;;  %v735_v5 = vld [vmem:[#allocation5 + $0x20] sm:$0xff]   ;;  %s901_s16 = smov [#allocation11]  }
  0x3e   :  { %662 = vmatprep.subr.bf16.mxu1 %v899_v0  ;;  %678 = vmatprep.mubr.msk.bf16.mxu1 %vm900_vm0, %v899_v0  ;;  %v741_v6 = vld [vmem:[#allocation7 + $0x30] sm:$0xff]   ;;  %v736_v7 = vld [vmem:[#allocation5 + $0x18] sm:$0xff]   ;;  %v742_v8 = vld [vmem:[#allocation7 + $0x28] sm:$0xff]   ;;  %s559_s17 = sshll.u32 %s901_s16, 4  ;;  %s560_s17 = int_to_ptr.vmem [resolvable:$true] %s559_s17 }
  0x3f   :  { %643 = vmatpush3.bf16.msra.mxu0 %v732_v1  ;;  %663 = vmatpush3.bf16.msra.mxu1 %v740_v4  ;;  %v737_v9 = vld [vmem:[#allocation5 + $0x10] sm:$0xff]   ;;  %v743_v10 = vld [vmem:[#allocation7 + $0x20] sm:$0xff]   ;;  %v738_v11 = vld [vmem:[#allocation5 + $0x8] sm:$0xff]   ;;  %p869_p12 = scmp.lt.s32.totalorder %s560_s17, %s560_s17 }
  0x40   :  { %644 = vmatprep.subr.bf16.mxu0 %v899_v0  ;;  %664 = vmatprep.subr.bf16.mxu1 %v899_v0  ;;  %v744_v12 = vld [vmem:[#allocation7 + $0x18] sm:$0xff]   ;;  %v739_v13 = vld [vmem:[#allocation5] sm:$0xff]   ;;  %v745_v15 = vld [vmem:[#allocation7 + $0x10] sm:$0xff]  }
  0x41   :  { %v100_v14 = vld [vmem:[#allocation2] sm:$0xff]  ;;  %v746_v17 = vld [vmem:[#allocation7 + $0x8] sm:$0xff]   ;;  %v747_v18 = vld [vmem:[#allocation7] sm:$0xff]  }
  0x42   :  { %v118_v16 = vpack.c.bf16 %v100_v14, %v100_v14  ;;  %v748_v19 = vld [vmem:[#allocation8 + $0x38] sm:$0xff]   ;;  %v749_v20 = vld [vmem:[#allocation8 + $0x30] sm:$0xff]   ;;  %v750_v21 = vld [vmem:[#allocation8 + $0x28] sm:$0xff]  }
  0x43   :  { %645 = vmatpush3.bf16.msra.mxu0 %v733_v2  ;;  %665 = vmatpush3.bf16.msra.mxu1 %v741_v6  ;;  %v751_v22 = vld [vmem:[#allocation8 + $0x20] sm:$0xff]   ;;  %v752_v23 = vld [vmem:[#allocation8 + $0x18] sm:$0xff]   ;;  %v753_v24 = vld [vmem:[#allocation8 + $0x10] sm:$0xff]  }
  0x44   :  { %646 = vmatprep.subr.bf16.mxu0 %v899_v0  ;;  %666 = vmatprep.subr.bf16.mxu1 %v899_v0  ;;  %v570_v25 = vld [vmem:[%s1036_s2] ss:$0 sm:$0xff]  ;;  %v754_v33 = vld [vmem:[#allocation8 + $0x8] sm:$0xff]   ;;  %v755_v34 = vld [vmem:[#allocation8] sm:$0xff]  }
  0x45   :  { %v756_v35 = vld [vmem:[#allocation10 + $0x38] sm:$0xff]   ;;  %v757_v36 = vld [vmem:[#allocation10 + $0x30] sm:$0xff]   ;;  %v758_v37 = vld [vmem:[#allocation10 + $0x28] sm:$0xff]  }
  0x46   :  { %v759_v38 = vld [vmem:[#allocation10 + $0x20] sm:$0xff]   ;;  %v760_v39 = vld [vmem:[#allocation10 + $0x18] sm:$0xff]   ;;  %v761_v40 = vld [vmem:[#allocation10 + $0x10] sm:$0xff]  }
  0x47   :  { %647 = vmatpush3.bf16.msra.mxu0 %v734_v3  ;;  %667 = vmatpush3.bf16.msra.mxu1 %v742_v8  ;;  %v579_v41 = vld [vmem:[%s1038_s4] ss:$0 sm:$0xff]  ;;  %v762_v49 = vld [vmem:[#allocation10 + $0x8] sm:$0xff]   ;;  %v763_v50 = vld [vmem:[#allocation10] sm:$0xff]  }
  0x48   :  { %648 = vmatprep.subr.bf16.mxu0 %v899_v0  ;;  %668 = vmatprep.subr.bf16.mxu1 %v899_v0  ;;  %v588_v51 = vld [vmem:[%s1040_s6] ss:$0 sm:$0xff]  ;;  %s864_s6 = scalar_lea.vmem %s560_s17, 128 }
  0x49   :  { %v597_v59 = vld [vmem:[%s1042_s8] ss:$0 sm:$0xff]  ;;  %p865_p11 = scmp.ne.s32.totalorder %s560_s17, %s864_s6  ;;  %p870_p13 = scmp.lt.s32.totalorder %s864_s6, %s864_s6 }
  0x4b   :  { %649 = vmatpush3.bf16.msra.mxu0 %v735_v5  ;;  %669 = vmatpush3.bf16.msra.mxu1 %v743_v10  ;;  %p871_p0 = por %p870_p13, %p869_p12 }
  0x4c   :  { %650 = vmatprep.subr.bf16.mxu0 %v899_v0  ;;  %670 = vmatprep.subr.bf16.mxu1 %v899_v0 }
  0x4d   :  { %p872_p1 = pnand %p871_p0, %p865_p11 }
  0x4f   :  { %651 = vmatpush3.bf16.msra.mxu0 %v736_v7  ;;  %671 = vmatpush3.bf16.msra.mxu1 %v744_v12 }
  0x50   :  { %652 = vmatprep.subr.bf16.mxu0 %v899_v0  ;;  %672 = vmatprep.subr.bf16.mxu1 %v899_v0 }
  0x53   :  { %653 = vmatpush3.bf16.msra.mxu0 %v737_v9  ;;  %673 = vmatpush3.bf16.msra.mxu1 %v745_v15 }
  0x54   :  { %654 = vmatprep.subr.bf16.mxu0 %v899_v0  ;;  %674 = vmatprep.subr.bf16.mxu1 %v899_v0 }
  0x57   :  { %655 = vmatpush3.bf16.msra.mxu0 %v738_v11  ;;  %675 = vmatpush3.bf16.msra.mxu1 %v746_v17 }
  0x58   :  { %656 = vmatprep.subr.bf16.mxu0 %v899_v0  ;;  %676 = vmatprep.subr.bf16.mxu1 %v899_v0 }
  0x5b   :  { %657 = vmatpush3.bf16.msra.mxu0 %v739_v13  ;;  %677 = vmatpush3.bf16.msra.mxu1 %v747_v18 }
  0x5c   :  { %682 = vmatprep.subr.bf16.mxu0 %v899_v0  ;;  %702 = vmatprep.subr.bf16.mxu1 %v899_v0 }
  0x5e   :  { %659 = vmatmul.mubr.bf16.vlgmr.msra.gmra.mxu0 %v118_v16 }
  0x5f   :  { %698 = vmatprep.mubr.msk.bf16.mxu0 %vm900_vm0, %v899_v0  ;;  %683 = vmatpush3.bf16.msra.mxu0 %v748_v19 }
  0x60   :  { %684 = vmatprep.subr.bf16.mxu0 %v899_v0 }
  0x63   :  { %685 = vmatpush3.bf16.msra.mxu0 %v749_v20 }
  0x64   :  { %686 = vmatprep.subr.bf16.mxu0 %v899_v0 }
  0x67   :  { %687 = vmatpush3.bf16.msra.mxu0 %v750_v21 }
  0x68   :  { %688 = vmatprep.subr.bf16.mxu0 %v899_v0 }
  0x6b   :  { %689 = vmatpush3.bf16.msra.mxu0 %v751_v22 }
  0x6c   :  { %690 = vmatprep.subr.bf16.mxu0 %v899_v0 }
  0x6f   :  { %691 = vmatpush3.bf16.msra.mxu0 %v752_v23 }
  0x70   :  { %692 = vmatprep.subr.bf16.mxu0 %v899_v0 }
  0x73   :  { %693 = vmatpush3.bf16.msra.mxu0 %v753_v24 }
  0x74   :  { %694 = vmatprep.subr.bf16.mxu0 %v899_v0 }
  0x77   :  { %695 = vmatpush3.bf16.msra.mxu0 %v754_v33 }
  0x78   :  { %696 = vmatprep.subr.bf16.mxu0 %v899_v0 }
  0x7b   :  { %697 = vmatpush3.bf16.msra.mxu0 %v755_v34 }
 0x11e   :  { %v207_v26 = vpop.f32.mrf.mxu0 }
 0x11f   :  { %v208_v27 = vadd.f32 %v570_v25, %v207_v26 }
 0x120   :  { %v660_v28 = vpop.f32.mrf.mxu0 }
 0x121   :  { %v213_v29 = vmax.f32 %v208_v27, 0.0 }
 0x122   :  { %v210_v30 = vpop.f32.mrf.mxu0 }
 0x123   :  { %v231_v31 = vpack.c.bf16 %v213_v29, %v213_v29 }
 0x124   :  { %v661_v32 = vpop.f32.mrf.mxu0 }
 0x125   :  { %679 = vmatmul.mubr.bf16.vlgmr.msra.gmra.mxu1 %v231_v31 }
 0x126   :  { %718 = vmatprep.mubr.msk.bf16.mxu1 %vm900_vm0, %v899_v0  ;;  %703 = vmatpush3.bf16.msra.mxu1 %v756_v35 }
 0x127   :  { %704 = vmatprep.subr.bf16.mxu1 %v899_v0 }
 0x12a   :  { %705 = vmatpush3.bf16.msra.mxu1 %v757_v36 }
 0x12b   :  { %706 = vmatprep.subr.bf16.mxu1 %v899_v0 }
 0x12e   :  { %707 = vmatpush3.bf16.msra.mxu1 %v758_v37 }
 0x12f   :  { %708 = vmatprep.subr.bf16.mxu1 %v899_v0 }
 0x132   :  { %709 = vmatpush3.bf16.msra.mxu1 %v759_v38 }
 0x133   :  { %710 = vmatprep.subr.bf16.mxu1 %v899_v0 }
 0x136   :  { %711 = vmatpush3.bf16.msra.mxu1 %v760_v39 }
 0x137   :  { %712 = vmatprep.subr.bf16.mxu1 %v899_v0 }
 0x13a   :  { %713 = vmatpush3.bf16.msra.mxu1 %v761_v40 }
 0x13b   :  { %714 = vmatprep.subr.bf16.mxu1 %v899_v0 }
 0x13e   :  { %715 = vmatpush3.bf16.msra.mxu1 %v762_v49 }
 0x13f   :  { %716 = vmatprep.subr.bf16.mxu1 %v899_v0 }
 0x142   :  { %717 = vmatpush3.bf16.msra.mxu1 %v763_v50 }
 0x1e5   :  { %v320_v42 = vpop.f32.mrf.mxu1 }
 0x1e6   :  { %v321_v43 = vadd.f32 %v579_v41, %v320_v42 }
 0x1e7   :  { %v680_v44 = vpop.f32.mrf.mxu1 }
 0x1e8   :  { %v326_v45 = vmax.f32 %v321_v43, 0.0 }
 0x1e9   :  { %v323_v46 = vpop.f32.mrf.mxu1 }
 0x1ea   :  { %v344_v47 = vpack.c.bf16 %v326_v45, %v326_v45 }
 0x1eb   :  { %v681_v48 = vpop.f32.mrf.mxu1 }
 0x1ec   :  { %699 = vmatmul.mubr.bf16.vlgmr.msra.gmra.mxu0 %v344_v47 }
 0x2ac   :  { %v433_v52 = vpop.f32.mrf.mxu0 }
 0x2ad   :  { %v434_v53 = vadd.f32 %v588_v51, %v433_v52 }
 0x2ae   :  { %v700_v54 = vpop.f32.mrf.mxu0 }
 0x2af   :  { %v439_v55 = vmax.f32 %v434_v53, 0.0 }
 0x2b0   :  { %v436_v56 = vpop.f32.mrf.mxu0 }
 0x2b1   :  { %v457_v57 = vpack.c.bf16 %v439_v55, %v439_v55 }
 0x2b2   :  { %v701_v58 = vpop.f32.mrf.mxu0 }
 0x2b3   :  { %719 = vmatmul.mubr.bf16.vlgmr.msra.gmra.mxu1 %v457_v57 }
 0x373   :  { %v546_v60 = vpop.f32.mrf.mxu1 }
 0x374   :  { %v547_v61 = vadd.f32 %v597_v59, %v546_v60 }
 0x375   :  { %v720_v62 = vpop.f32.mrf.mxu1 }
 0x376   :  { %552 = vst [vmem:[#allocation11] sm:$0xff] %v547_v61 }
 0x377   :  { %v549_v63 = vpop.f32.mrf.mxu1 }
 0x378   :  { %875 = shalt.err (!%p872_p1)
}
 0x379   :  { %562 = dma.vmem_to_hbm [thread:$0]  %s560_s17, 128, %s1043_s9, [#allocation4]   ;;  %v721_v0 = vpop.f32.mrf.mxu1 }
 0x37a   :  { %890 = dma.done.wait [#allocation4], 128  }
 0x37b   :  { %891 = vsyncadd [#allocation4], 4294967168 }
 0x37c   :  { %566 = vsyncpa [#allocation3], 1 }
 0x37d   :  { %567 = vsyncpa [#allocation6], 1 }
 0x37e   :  { %568 = vsyncpa [#allocation9], 1 }
 0x37f   :  { %569 = vsyncpa [#allocation4], 1 }

// kernel: tpu_custom_call.1
= control target key start
LH: loop header
LB: loop body
LE: loop exit
PB: predicated region body
PF: predicated region fallthrough
CT: control target
= control target key end

     0   :  { %14 = vsyncpa [#allocation3], 0  ;;  %s1034_s0 = inlined_call_operand.hbm [shape: f32[8,128], index: 0, kind: input, shape index: {}]   ;;  %s1035_s1 = inlined_call_operand.hbm [shape: bf16[128,128], index: 1, kind: input, shape index: {}]   ;;  %s1036_s2 = inlined_call_operand.vmem [shape: f32[1,128], index: 2, kind: input, shape index: {}]   ;;  %s1037_s3 = inlined_call_operand.hbm [shape: bf16[128,128], index: 3, kind: input, shape index: {}]   ;;  %s1038_s4 = inlined_call_operand.vmem [shape: f32[1,128], index: 4, kind: input, shape index: {}]   ;;  %s1039_s5 = inlined_call_operand.hbm [shape: bf16[128,128], index: 5, kind: input, shape index: {}]   ;;  %s1040_s6 = inlined_call_operand.vmem [shape: f32[1,128], index: 6, kind: input, shape index: {}]   ;;  %s1041_s7 = inlined_call_operand.hbm [shape: bf16[128,128], index: 7, kind: input, shape index: {}]   ;;  %s1042_s8 = inlined_call_operand.vmem [shape: f32[1,128], index: 8, kind: input, shape index: {}]   ;;  %s1043_s9 = inlined_call_operand.hbm [shape: f32[8,128], index: 9, kind: output, shape index: {}]  }
   0x1   :  { %15 = vsyncpa [#allocation6], 0 }
   0x2   :  { %16 = vsyncpa [#allocation9], 0 }
   0x3   :  { %17 = vsyncpa [#allocation4], 0  ;;  %s892_s30 = smov [#allocation5]  }
   0x4   :  { %s33_s10 = sshll.u32 %s892_s30, 4  ;;  %s34_s10 = int_to_ptr.vmem [resolvable:$true] %s33_s10 }
   0x5   :  { %s772_s11 = scalar_lea.vmem %s34_s10, 1024  ;;  %p777_p1 = scmp.lt.s32.totalorder %s34_s10, %s34_s10 }
   0x6   :  { %p773_p0 = scmp.ne.s32.totalorder %s34_s10, %s772_s11  ;;  %p778_p2 = scmp.lt.s32.totalorder %s772_s11, %s772_s11 }
   0x8   :  { %p779_p3 = por %p778_p2, %p777_p1 }
   0xa   :  { %p780_p4 = pnand %p779_p3, %p773_p0 }
   0xc   :  { %783 = shalt.err (!%p780_p4)
}
   0xd   :  { %s893_s12 = smov 64   ;;  %s894_s13 = smov 4  }
   0xe   :  { %39 = dma.hbm_to_vmem [thread:$0]  %s1035_s1, 1024, %s34_s10, [#allocation6], %s893_s12, %s893_s12, %s894_s13  }
   0xf   :  { %s895_s16 = smov [#allocation8]   ;;  %s896_s18 = smov [#allocation2]  }
  0x10   :  { %s61_s17 = sshll.u32 %s895_s16, 4  ;;  %s24_s19 = sshll.u32 %s896_s18, 4  ;;  %s62_s17 = int_to_ptr.vmem [resolvable:$true] %s61_s17  ;;  %s25_s19 = int_to_ptr.vmem [resolvable:$true] %s24_s19 }
  0x11   :  { %s792_s20 = scalar_lea.vmem %s62_s17, 1024  ;;  %p797_p6 = scmp.lt.s32.totalorder %s62_s17, %s62_s17 }
  0x12   :  { %p793_p5 = scmp.ne.s32.totalorder %s62_s17, %s792_s20  ;;  %p798_p7 = scmp.lt.s32.totalorder %s792_s20, %s792_s20 }
  0x14   :  { %p799_p8 = por %p798_p7, %p797_p6 }
  0x16   :  { %p800_p9 = pnand %p799_p8, %p793_p5 }
  0x18   :  { %803 = shalt.err (!%p800_p9)
}
  0x19   :  { %67 = dma.hbm_to_vmem [thread:$0]  %s1039_s5, 1024, %s62_s17, [#allocation9], %s893_s12, %s893_s12, %s894_s13  }
  0x1a   :  { %s812_s1 = scalar_lea.vmem %s25_s19, 128  ;;  %p817_p11 = scmp.lt.s32.totalorder %s25_s19, %s25_s19 }
  0x1b   :  { %p813_p10 = scmp.ne.s32.totalorder %s25_s19, %s812_s1  ;;  %p818_p12 = scmp.lt.s32.totalorder %s812_s1, %s812_s1 }
  0x1d   :  { %p819_p13 = por %p818_p12, %p817_p11 }
  0x1f   :  { %p820_p0 = pnand %p819_p13, %p813_p10 }
  0x21   :  { %823 = shalt.err (!%p820_p0)
}
  0x22   :  { %27 = dma.hbm_to_vmem [thread:$0]  %s1034_s0, 128, %s25_s19, [#allocation3]  }
  0x23   :  { %s897_s25 = smov [#allocation7]   ;;  %s898_s27 = smov [#allocation10]  }
  0x24   :  { %s47_s26 = sshll.u32 %s897_s25, 4  ;;  %s75_s28 = sshll.u32 %s898_s27, 4  ;;  %s48_s26 = int_to_ptr.vmem [resolvable:$true] %s47_s26  ;;  %s76_s28 = int_to_ptr.vmem [resolvable:$true] %s75_s28 }
  0x25   :  { %s832_s29 = scalar_lea.vmem %s48_s26, 1024  ;;  %p837_p2 = scmp.lt.s32.totalorder %s48_s26, %s48_s26 }
  0x26   :  { %p833_p1 = scmp.ne.s32.totalorder %s48_s26, %s832_s29  ;;  %p838_p3 = scmp.lt.s32.totalorder %s832_s29, %s832_s29 }
  0x28   :  { %p839_p4 = por %p838_p3, %p837_p2 }
  0x2a   :  { %p840_p5 = pnand %p839_p4, %p833_p1 }
  0x2c   :  { %843 = shalt.err (!%p840_p5)
}
  0x2d   :  { %53 = dma.hbm_to_vmem [thread:$0]  %s1037_s3, 1024, %s48_s26, [#allocation6], %s893_s12, %s893_s12, %s894_s13  }
  0x2e   :  { %s852_s0 = scalar_lea.vmem %s76_s28, 1024  ;;  %p857_p7 = scmp.lt.s32.totalorder %s76_s28, %s76_s28 }
  0x2f   :  { %p853_p6 = scmp.ne.s32.totalorder %s76_s28, %s852_s0  ;;  %p858_p8 = scmp.lt.s32.totalorder %s852_s0, %s852_s0 }
  0x31   :  { %p859_p9 = por %p858_p8, %p857_p7 }
  0x33   :  { %p860_p10 = pnand %p859_p9, %p853_p6 }
  0x35   :  { %863 = shalt.err (!%p860_p10)
}
  0x36   :  { %81 = dma.hbm_to_vmem [thread:$0]  %s1041_s7, 1024, %s76_s28, [#allocation9], %s893_s12, %s893_s12, %s894_s13  }
  0x37   :  { %884 = dma.done.wait [#allocation3], 128  }
  0x38   :  { %885 = vsyncadd [#allocation3], 4294967168 }
  0x39   :  { %886 = dma.done.wait [#allocation6], 2048  }
  0x3a   :  { %887 = vsyncadd [#allocation6], 4294965248 }
  0x3b   :  { %888 = dma.done.wait [#allocation9], 2048  }
  0x3c   :  { %889 = vsyncadd [#allocation9], 4294965248  ;;  %v899_v0 = vmov 0.0   ;;  %vm900_vm0 = vmmov 0   ;;  %v732_v1 = vld [vmem:[#allocation5 + $0x38] sm:$0xff]   ;;  %v733_v2 = vld [vmem:[#allocation5 + $0x30] sm:$0xff]  }
  0x3d   :  { %642 = vmatprep.subr.bf16.mxu0 %v899_v0  ;;  %658 = vmatprep.mubr.msk.bf16.mxu0 %vm900_vm0, %v899_v0  ;;  %v734_v3 = vld [vmem:[#allocation5 + $0x28] sm:$0xff]   ;;  %v740_v4 = vld [vmem:[#allocation7 + $0x38] sm:$0xff]   ;;  %v735_v5 = vld [vmem:[#allocation5 + $0x20] sm:$0xff]   ;;  %s901_s16 = smov [#allocation11]  }
  0x3e   :  { %662 = vmatprep.subr.bf16.mxu1 %v899_v0  ;;  %678 = vmatprep.mubr.msk.bf16.mxu1 %vm900_vm0, %v899_v0  ;;  %v741_v6 = vld [vmem:[#allocation7 + $0x30] sm:$0xff]   ;;  %v736_v7 = vld [vmem:[#allocation5 + $0x18] sm:$0xff]   ;;  %v742_v8 = vld [vmem:[#allocation7 + $0x28] sm:$0xff]   ;;  %s559_s17 = sshll.u32 %s901_s16, 4  ;;  %s560_s17 = int_to_ptr.vmem [resolvable:$true] %s559_s17 }
  0x3f   :  { %643 = vmatpush3.bf16.msra.mxu0 %v732_v1  ;;  %663 = vmatpush3.bf16.msra.mxu1 %v740_v4  ;;  %v737_v9 = vld [vmem:[#allocation5 + $0x10] sm:$0xff]   ;;  %v743_v10 = vld [vmem:[#allocation7 + $0x20] sm:$0xff]   ;;  %v738_v11 = vld [vmem:[#allocation5 + $0x8] sm:$0xff]   ;;  %p869_p12 = scmp.lt.s32.totalorder %s560_s17, %s560_s17 }
  0x40   :  { %644 = vmatprep.subr.bf16.mxu0 %v899_v0  ;;  %664 = vmatprep.subr.bf16.mxu1 %v899_v0  ;;  %v744_v12 = vld [vmem:[#allocation7 + $0x18] sm:$0xff]   ;;  %v739_v13 = vld [vmem:[#allocation5] sm:$0xff]   ;;  %v745_v15 = vld [vmem:[#allocation7 + $0x10] sm:$0xff]  }
  0x41   :  { %v100_v14 = vld [vmem:[#allocation2] sm:$0xff]  ;;  %v746_v17 = vld [vmem:[#allocation7 + $0x8] sm:$0xff]   ;;  %v747_v18 = vld [vmem:[#allocation7] sm:$0xff]  }
  0x42   :  { %v118_v16 = vpack.c.bf16 %v100_v14, %v100_v14  ;;  %v748_v19 = vld [vmem:[#allocation8 + $0x38] sm:$0xff]   ;;  %v749_v20 = vld [vmem:[#allocation8 + $0x30] sm:$0xff]   ;;  %v750_v21 = vld [vmem:[#allocation8 + $0x28] sm:$0xff]  }
  0x43   :  { %645 = vmatpush3.bf16.msra.mxu0 %v733_v2  ;;  %665 = vmatpush3.bf16.msra.mxu1 %v741_v6  ;;  %v751_v22 = vld [vmem:[#allocation8 + $0x20] sm:$0xff]   ;;  %v752_v23 = vld [vmem:[#allocation8 + $0x18] sm:$0xff]   ;;  %v753_v24 = vld [vmem:[#allocation8 + $0x10] sm:$0xff]  }
  0x44   :  { %646 = vmatprep.subr.bf16.mxu0 %v899_v0  ;;  %666 = vmatprep.subr.bf16.mxu1 %v899_v0  ;;  %v570_v25 = vld [vmem:[%s1036_s2] ss:$0 sm:$0xff]  ;;  %v754_v33 = vld [vmem:[#allocation8 + $0x8] sm:$0xff]   ;;  %v755_v34 = vld [vmem:[#allocation8] sm:$0xff]  }
  0x45   :  { %v756_v35 = vld [vmem:[#allocation10 + $0x38] sm:$0xff]   ;;  %v757_v36 = vld [vmem:[#allocation10 + $0x30] sm:$0xff]   ;;  %v758_v37 = vld [vmem:[#allocation10 + $0x28] sm:$0xff]  }
  0x46   :  { %v759_v38 = vld [vmem:[#allocation10 + $0x20] sm:$0xff]   ;;  %v760_v39 = vld [vmem:[#allocation10 + $0x18] sm:$0xff]   ;;  %v761_v40 = vld [vmem:[#allocation10 + $0x10] sm:$0xff]  }
  0x47   :  { %647 = vmatpush3.bf16.msra.mxu0 %v734_v3  ;;  %667 = vmatpush3.bf16.msra.mxu1 %v742_v8  ;;  %v579_v41 = vld [vmem:[%s1038_s4] ss:$0 sm:$0xff]  ;;  %v762_v49 = vld [vmem:[#allocation10 + $0x8] sm:$0xff]   ;;  %v763_v50 = vld [vmem:[#allocation10] sm:$0xff]  }
  0x48   :  { %648 = vmatprep.subr.bf16.mxu0 %v899_v0  ;;  %668 = vmatprep.subr.bf16.mxu1 %v899_v0  ;;  %v588_v51 = vld [vmem:[%s1040_s6] ss:$0 sm:$0xff]  ;;  %s864_s6 = scalar_lea.vmem %s560_s17, 128 }
  0x49   :  { %v597_v59 = vld [vmem:[%s1042_s8] ss:$0 sm:$0xff]  ;;  %p865_p11 = scmp.ne.s32.totalorder %s560_s17, %s864_s6  ;;  %p870_p13 = scmp.lt.s32.totalorder %s864_s6, %s864_s6 }
  0x4b   :  { %649 = vmatpush3.bf16.msra.mxu0 %v735_v5  ;;  %669 = vmatpush3.bf16.msra.mxu1 %v743_v10  ;;  %p871_p0 = por %p870_p13, %p869_p12 }
  0x4c   :  { %650 = vmatprep.subr.bf16.mxu0 %v899_v0  ;;  %670 = vmatprep.subr.bf16.mxu1 %v899_v0 }
  0x4d   :  { %p872_p1 = pnand %p871_p0, %p865_p11 }
  0x4f   :  { %651 = vmatpush3.bf16.msra.mxu0 %v736_v7  ;;  %671 = vmatpush3.bf16.msra.mxu1 %v744_v12 }
  0x50   :  { %652 = vmatprep.subr.bf16.mxu0 %v899_v0  ;;  %672 = vmatprep.subr.bf16.mxu1 %v899_v0 }
  0x53   :  { %653 = vmatpush3.bf16.msra.mxu0 %v737_v9  ;;  %673 = vmatpush3.bf16.msra.mxu1 %v745_v15 }
  0x54   :  { %654 = vmatprep.subr.bf16.mxu0 %v899_v0  ;;  %674 = vmatprep.subr.bf16.mxu1 %v899_v0 }
  0x57   :  { %655 = vmatpush3.bf16.msra.mxu0 %v738_v11  ;;  %675 = vmatpush3.bf16.msra.mxu1 %v746_v17 }
  0x58   :  { %656 = vmatprep.subr.bf16.mxu0 %v899_v0  ;;  %676 = vmatprep.subr.bf16.mxu1 %v899_v0 }
  0x5b   :  { %657 = vmatpush3.bf16.msra.mxu0 %v739_v13  ;;  %677 = vmatpush3.bf16.msra.mxu1 %v747_v18 }
  0x5c   :  { %682 = vmatprep.subr.bf16.mxu0 %v899_v0  ;;  %702 = vmatprep.subr.bf16.mxu1 %v899_v0 }
  0x5e   :  { %659 = vmatmul.mubr.bf16.vlgmr.msra.gmra.mxu0 %v118_v16 }
  0x5f   :  { %698 = vmatprep.mubr.msk.bf16.mxu0 %vm900_vm0, %v899_v0  ;;  %683 = vmatpush3.bf16.msra.mxu0 %v748_v19 }
  0x60   :  { %684 = vmatprep.subr.bf16.mxu0 %v899_v0 }
  0x63   :  { %685 = vmatpush3.bf16.msra.mxu0 %v749_v20 }
  0x64   :  { %686 = vmatprep.subr.bf16.mxu0 %v899_v0 }
  0x67   :  { %687 = vmatpush3.bf16.msra.mxu0 %v750_v21 }
  0x68   :  { %688 = vmatprep.subr.bf16.mxu0 %v899_v0 }
  0x6b   :  { %689 = vmatpush3.bf16.msra.mxu0 %v751_v22 }
  0x6c   :  { %690 = vmatprep.subr.bf16.mxu0 %v899_v0 }
  0x6f   :  { %691 = vmatpush3.bf16.msra.mxu0 %v752_v23 }
  0x70   :  { %692 = vmatprep.subr.bf16.mxu0 %v899_v0 }
  0x73   :  { %693 = vmatpush3.bf16.msra.mxu0 %v753_v24 }
  0x74   :  { %694 = vmatprep.subr.bf16.mxu0 %v899_v0 }
  0x77   :  { %695 = vmatpush3.bf16.msra.mxu0 %v754_v33 }
  0x78   :  { %696 = vmatprep.subr.bf16.mxu0 %v899_v0 }
  0x7b   :  { %697 = vmatpush3.bf16.msra.mxu0 %v755_v34 }
 0x11e   :  { %v207_v26 = vpop.f32.mrf.mxu0 }
 0x11f   :  { %v208_v27 = vadd.f32 %v570_v25, %v207_v26 }
 0x120   :  { %v660_v28 = vpop.f32.mrf.mxu0 }
 0x121   :  { %v213_v29 = vmax.f32 %v208_v27, 0.0 }
 0x122   :  { %v210_v30 = vpop.f32.mrf.mxu0 }
 0x123   :  { %v231_v31 = vpack.c.bf16 %v213_v29, %v213_v29 }
 0x124   :  { %v661_v32 = vpop.f32.mrf.mxu0 }
 0x125   :  { %679 = vmatmul.mubr.bf16.vlgmr.msra.gmra.mxu1 %v231_v31 }
 0x126   :  { %718 = vmatprep.mubr.msk.bf16.mxu1 %vm900_vm0, %v899_v0  ;;  %703 = vmatpush3.bf16.msra.mxu1 %v756_v35 }
 0x127   :  { %704 = vmatprep.subr.bf16.mxu1 %v899_v0 }
 0x12a   :  { %705 = vmatpush3.bf16.msra.mxu1 %v757_v36 }
 0x12b   :  { %706 = vmatprep.subr.bf16.mxu1 %v899_v0 }
 0x12e   :  { %707 = vmatpush3.bf16.msra.mxu1 %v758_v37 }
 0x12f   :  { %708 = vmatprep.subr.bf16.mxu1 %v899_v0 }
 0x132   :  { %709 = vmatpush3.bf16.msra.mxu1 %v759_v38 }
 0x133   :  { %710 = vmatprep.subr.bf16.mxu1 %v899_v0 }
 0x136   :  { %711 = vmatpush3.bf16.msra.mxu1 %v760_v39 }
 0x137   :  { %712 = vmatprep.subr.bf16.mxu1 %v899_v0 }
 0x13a   :  { %713 = vmatpush3.bf16.msra.mxu1 %v761_v40 }
 0x13b   :  { %714 = vmatprep.subr.bf16.mxu1 %v899_v0 }
 0x13e   :  { %715 = vmatpush3.bf16.msra.mxu1 %v762_v49 }
 0x13f   :  { %716 = vmatprep.subr.bf16.mxu1 %v899_v0 }
 0x142   :  { %717 = vmatpush3.bf16.msra.mxu1 %v763_v50 }
 0x1e5   :  { %v320_v42 = vpop.f32.mrf.mxu1 }
 0x1e6   :  { %v321_v43 = vadd.f32 %v579_v41, %v320_v42 }
 0x1e7   :  { %v680_v44 = vpop.f32.mrf.mxu1 }
 0x1e8   :  { %v326_v45 = vmax.f32 %v321_v43, 0.0 }
 0x1e9   :  { %v323_v46 = vpop.f32.mrf.mxu1 }
 0x1ea   :  { %v344_v47 = vpack.c.bf16 %v326_v45, %v326_v45 }
 0x1eb   :  { %v681_v48 = vpop.f32.mrf.mxu1 }
 0x1ec   :  { %699 = vmatmul.mubr.bf16.vlgmr.msra.gmra.mxu0 %v344_v47 }
 0x2ac   :  { %v433_v52 = vpop.f32.mrf.mxu0 }
 0x2ad   :  { %v434_v53 = vadd.f32 %v588_v51, %v433_v52 }
 0x2ae   :  { %v700_v54 = vpop.f32.mrf.mxu0 }
 0x2af   :  { %v439_v55 = vmax.f32 %v434_v53, 0.0 }
 0x2b0   :  { %v436_v56 = vpop.f32.mrf.mxu0 }
 0x2b1   :  { %v457_v57 = vpack.c.bf16 %v439_v55, %v439_v55 }
 0x2b2   :  { %v701_v58 = vpop.f32.mrf.mxu0 }
 0x2b3   :  { %719 = vmatmul.mubr.bf16.vlgmr.msra.gmra.mxu1 %v457_v57 }
 0x373   :  { %v546_v60 = vpop.f32.mrf.mxu1 }
 0x374   :  { %v547_v61 = vadd.f32 %v597_v59, %v546_v60 }
 0x375   :  { %v720_v62 = vpop.f32.mrf.mxu1 }
 0x376   :  { %552 = vst [vmem:[#allocation11] sm:$0xff] %v547_v61 }
 0x377   :  { %v549_v63 = vpop.f32.mrf.mxu1 }
 0x378   :  { %875 = shalt.err (!%p872_p1)
}
 0x379   :  { %562 = dma.vmem_to_hbm [thread:$0]  %s560_s17, 128, %s1043_s9, [#allocation4]   ;;  %v721_v0 = vpop.f32.mrf.mxu1 }
 0x37a   :  { %890 = dma.done.wait [#allocation4], 128  }
 0x37b   :  { %891 = vsyncadd [#allocation4], 4294967168 }
 0x37c   :  { %566 = vsyncpa [#allocation3], 1 }
 0x37d   :  { %567 = vsyncpa [#allocation6], 1 }
 0x37e   :  { %568 = vsyncpa [#allocation9], 1 }
 0x37f   :  { %569 = vsyncpa [#allocation4], 1 }

</bundles_post_ra>
